<compile_context>
chip_gen: v6e
topology: v6e:2x2x1
jax: 0.10.0
libtpu: 0.0.40
codegen_flags: <defaults>
</compile_context>

<pallas_src>
import functools

import numpy as np
import jax
import jax.numpy as jnp
from jax.experimental import pallas as pl
from jax.experimental.pallas import tpu as pltpu


def _focal_kernel(logits_ref, tgt_ref, part_ref, *, gamma, total_p):
    i = pl.program_id(0)

    x = logits_ref[...].astype(jnp.float32)                   # (C, TP), cast in VMEM
    C, TP = x.shape
    tgt = tgt_ref[...]                                         # (1, TP) int32, -1 == masked out

    # Numerically-stable log-softmax pieces over the class (sublane) axis.
    xmax = jnp.max(x, axis=0, keepdims=True)                   # (1, TP)
    z = x - xmax
    ez = jnp.exp(z)                                            # (C, TP), reused below
    sez = jnp.sum(ez, axis=0, keepdims=True)                   # (1, TP)
    lse = jnp.log(sez)

    # Fused one-hot gathers: pick the target-class shifted logit (for logpt) and its
    # already-computed exp (for pt) -- no full (C, TP) log-prob temporary, and no extra
    # jnp.exp(logpt) transcendental (review item: EUP pressure on v6e/v7x).
    cls = jax.lax.broadcasted_iota(jnp.int32, (C, TP), 0)
    onehot = cls == tgt                                        # (C, TP) bool
    zt = jnp.sum(jnp.where(onehot, z, 0.0), axis=0, keepdims=True)
    ezt = jnp.sum(jnp.where(onehot, ez, 0.0), axis=0, keepdims=True)

    logpt = zt - lse                                           # (1, TP)
    pt = ezt * pl.reciprocal(sez, approx=True)                 # == exp(logpt)

    # Focal weight (1 - pt)^gamma: small integer gamma -> repeated multiply
    # (avoids pow = exp(g*log(x)) = 2 extra EUP transcendentals per position).
    q = 1.0 - pt
    g = float(gamma)
    if g == int(g) and 0 <= int(g) <= 8:
        w = jnp.ones_like(q)
        for _ in range(int(g)):
            w = w * q
    else:
        w = jnp.power(q, g)
    loss = -w * logpt                                          # (1, TP)

    # Validity comes pre-fused in the sentinel target; pos < total_p drops the garbage
    # lanes of the final partial tile (jnp.where does not propagate NaN/Inf from the
    # unselected branch, so junk logits in those lanes are harmless).
    pos = i * TP + jax.lax.broadcasted_iota(jnp.int32, (1, TP), 1)
    sel = jnp.logical_and(tgt >= 0, pos < total_p)

    tile_loss = jnp.sum(jnp.where(sel, loss, 0.0))
    tile_cnt = jnp.sum(jnp.where(sel, 1.0, 0.0))

    # Single lane-dense store per grid step: sublane row 0 = loss partial, row 1 = count.
    row = jax.lax.broadcasted_iota(jnp.int32, (1, 2, 128), 1)
    part_ref[...] = jnp.where(row == 0, tile_loss, tile_cnt).astype(jnp.float32)


def regression_focal_loss(logits_reg, image, mask, wlh, *, gamma=2.0, tile_p=32768):
    """input['logits_reg']=(1,C,H,W); target: image=(1,Cim,H,W), mask=(1,H,W), wlh=(1,3,H,W)."""
    B, C, H, W = logits_reg.shape
    if B != 1:
        # TODO(synk): the PyTorch masked view(1, C, -1) only pairs logits with targets
        # consistently for a single batch element; B > 1 has no well-defined reference.
        raise ValueError("RegressionFocalLoss Pallas kernel requires batch size 1.")
    P = H * W

    # (1,C,H,W) -> (C, P): pure reshape at B == 1 (no transpose, no HBM copy) and the
    # logits keep their producer dtype (bf16 stays bf16; the kernel casts in VMEM).
    logits_f = logits_reg.reshape(C, P)

    # Validity + target fused in the wrapper into ONE int32 stream (review: drop image /
    # mask as kernel inputs); -1 is the "masked out" sentinel tested by the kernel.
    img_valid = jnp.sum(image.astype(jnp.float32), axis=1) > 0           # (1,H,W)
    valid = jnp.logical_and(mask > 0, img_valid)                         # (1,H,W)
    # TODO(synk): PyTorch does not clip target class indices; out-of-range targets would
    # error there, here they are clamped into [0, C-1].
    tgt = jnp.clip(wlh[:, 2, :, :].astype(jnp.int32), 0, C - 1)
    tgt_f = jnp.where(valid, tgt, jnp.int32(-1)).reshape(1, P)

    # NOTE (review "pack the target into a spare logits sublane"): intentionally kept as a
    # separate (1, P) int32 stream -- building the packed (C+1, P) array would materialize
    # a full extra HBM round-trip of the logits in XLA (concat copy) and force an f32
    # upcast of bf16 logits, while the separate stream's DMA only moves its logical
    # 4 B/position; kernel-side bytes are identical.

    # Lane tile size: multiple of 128, default 32768 positions (amortizes the ~0.35 us
    # per-step overhead), clamped so the grid keeps >= 2 steps when the problem spans at
    # least two lane tiles (megacore-friendly on v7x; "parallel" is useless at G == 1).
    lane = 128
    tile_p = max(lane, (int(tile_p) // lane) * lane)
    p_pad = pl.cdiv(P, lane) * lane
    if p_pad >= 2 * lane:
        tile_p = min(tile_p, pl.cdiv(p_pad // 2, lane) * lane)
    else:
        tile_p = min(tile_p, p_pad)
    G = pl.cdiv(P, tile_p)

    # VMEM per step: 2x double-buffered inputs ((C*4 + 4) * tile_p bytes) + (1,2,128)
    # output + a few (C,tile_p)/(1,tile_p) f32 temporaries ~= 1.6 MiB at C=4, tile_p=32768
    # -- comfortably inside the default scoped VMEM on v5e (16 MiB) / v6e / v7x (32 MiB),
    # so no vmem_limit_bytes override is needed.
    part = pl.pallas_call(
        functools.partial(_focal_kernel, gamma=gamma, total_p=P),
        out_shape=jax.ShapeDtypeStruct((G, 2, 128), jnp.float32),
        grid_spec=pltpu.PrefetchScalarGridSpec(
            num_scalar_prefetch=0,
            grid=(G,),
            in_specs=[
                pl.BlockSpec((C, tile_p), lambda i: (0, i)),
                pl.BlockSpec((1, tile_p), lambda i: (0, i)),
            ],
            out_specs=pl.BlockSpec((1, 2, 128), lambda i: (i, 0, 0)),
        ),
        compiler_params=pltpu.CompilerParams(
            dimension_semantics=("parallel",)),
    )(logits_f, tgt_f)

    # Final reduce over G tiny partials in JAX (keeps the grid axis fully parallel).
    # For P >> 16M masked positions, summing these G partials in f64 would be free
    # insurance, but requires jax x64 and is unnecessary at typical sizes.
    num = jnp.sum(part[:, 0, 0])
    den = jnp.sum(part[:, 1, 0])
    # size_average=True -> mean over masked positions (NaN if none, same as torch).
    return num / den


def _reference_numpy(logits, image, mask, wlh, gamma):
    """Direct port of the PyTorch forward (B must be 1 for its reshape to be meaningful)."""
    logits = np.asarray(logits, np.float64)
    image = np.asarray(image, np.float64)
    mask = np.asarray(mask)
    wlh = np.asarray(wlh)
    B, C, H, W = logits.shape
    img = image.sum(axis=1, keepdims=True)                  # (B,1,H,W)
    tcls = mask[:, None]                                    # (B,1,H,W)
    th = wlh[:, 2:3]                                        # (B,1,H,W)
    m = (tcls > 0) & (img > 0)
    me = np.broadcast_to(m, (B, C, H, W))
    inp = logits[me].reshape(1, C, -1)                      # (1,C,N)
    tgt = th[m].reshape(-1).astype(np.int64)                # (N,)
    x = inp.transpose(0, 2, 1).reshape(-1, C)               # (N,C)
    mx = x.max(axis=1, keepdims=True)
    logp = x - mx - np.log(np.exp(x - mx).sum(axis=1, keepdims=True))
    logpt = np.take_along_axis(logp, tgt[:, None], axis=1).reshape(-1)
    pt = np.exp(logpt)
    loss = -np.power(1.0 - pt, gamma) * logpt
    return loss.mean()


if __name__ == "__main__":
    # B=1: the PyTorch masked view(1, C, -1) only pairs logits with targets
    # consistently for a single batch element.
    B, C, H, W = 1, 4, 24, 24          # P = 576: exercises multi-tile + tail masking
    Cim = 3
    key = jax.random.PRNGKey(0)
    k1, k2, k3, k4 = jax.random.split(key, 4)

    logits = jax.random.normal(k1, (B, C, H, W), jnp.float32)          # input['logits_reg']
    image = jax.random.uniform(k2, (B, Cim, H, W), jnp.float32,
                               minval=-1.0, maxval=1.0)                # target['image']
    mask = (jax.random.uniform(k3, (B, H, W)) > 0.5).astype(jnp.float32)  # target['mask']
    wlh = jax.random.randint(k4, (B, 3, H, W), 0, C).astype(jnp.int32)    # target['wlh']

    ref = _reference_numpy(logits, image, mask, wlh, gamma=2.0)

    # Small explicit tile -> 3 grid steps with a partial tail tile.
    loss_small = jax.block_until_ready(
        regression_focal_loss(logits, image, mask, wlh, gamma=2.0, tile_p=256))
    np.testing.assert_allclose(np.asarray(loss_small), ref, rtol=5e-4, atol=1e-6)

    # Default tile -> clamp keeps G == 2 (both v7x cores) with a partial tail tile.
    loss_big = jax.block_until_ready(
        regression_focal_loss(logits, image, mask, wlh, gamma=2.0))
    np.testing.assert_allclose(np.asarray(loss_big), ref, rtol=5e-4, atol=1e-6)

    print("KERNEL_OK")
</pallas_src>

<mosaic_0001>
module attributes {stable_mosaic.version = 11 : i64} {
  func.func @_focal_kernel(%arg0: i32, %arg1: memref<4x256xf32, #tpu.memory_space<vmem>>, %arg2: memref<1x256xi32, #tpu.memory_space<vmem>>, %arg3: memref<1x2x128xf32, #tpu.memory_space<vmem>>) attributes {dimension_semantics = [#tpu.dimension_semantics<parallel>], iteration_bounds = array<i64: 3>, scalar_prefetch = 0 : i64, scratch_operands = 0 : i64, tpu.core_type = #tpu.core_type<tc>, window_params = [{transform_indices = @transform_0, window_bounds = array<i64: 4, 256>}, {transform_indices = @transform_1, window_bounds = array<i64: 1, 256>}, {transform_indices = @transform_2, window_bounds = array<i64: 1, 2, 128>}]} {
    %c0 = arith.constant 0 : index
    %c0_0 = arith.constant 0 : index
    %0 = vector.load %arg1[%c0, %c0_0] : memref<4x256xf32, #tpu.memory_space<vmem>>, vector<4x256xf32>
    %c0_1 = arith.constant 0 : index
    %c0_2 = arith.constant 0 : index
    %1 = vector.load %arg2[%c0_1, %c0_2] : memref<1x256xi32, #tpu.memory_space<vmem>>, vector<1x256xi32>
    %cst = arith.constant dense<0xFF800000> : vector<256xf32>
    %2 = vector.multi_reduction <maximumf>, %0, %cst [0] : vector<4x256xf32> to vector<256xf32>
    %3 = vector.shape_cast %2 : vector<256xf32> to vector<1x256xf32>
    %4 = vector.broadcast %3 : vector<1x256xf32> to vector<4x256xf32>
    %5 = arith.subf %0, %4 : vector<4x256xf32>
    %6 = math.exp %5 : vector<4x256xf32>
    %cst_3 = arith.constant dense<0.000000e+00> : vector<256xf32>
    %7 = vector.multi_reduction <add>, %6, %cst_3 [0] : vector<4x256xf32> to vector<256xf32>
    %8 = vector.shape_cast %7 : vector<256xf32> to vector<1x256xf32>
    %9 = math.log %8 : vector<1x256xf32>
    %10 = tpu.iota {dimensions = array<i32: 0>} : vector<4x256xi32>
    %11 = vector.broadcast %1 : vector<1x256xi32> to vector<4x256xi32>
    %12 = arith.cmpi eq, %10, %11 : vector<4x256xi32>
    %cst_4 = arith.constant 0.000000e+00 : f32
    %13 = vector.broadcast %cst_4 : f32 to vector<4x256xf32>
    %14 = arith.select %12, %5, %13 : vector<4x256xi1>, vector<4x256xf32>
    %cst_5 = arith.constant dense<0.000000e+00> : vector<256xf32>
    %15 = vector.multi_reduction <add>, %14, %cst_5 [0] : vector<4x256xf32> to vector<256xf32>
    %16 = vector.shape_cast %15 : vector<256xf32> to vector<1x256xf32>
    %cst_6 = arith.constant 0.000000e+00 : f32
    %17 = vector.broadcast %cst_6 : f32 to vector<4x256xf32>
    %18 = arith.select %12, %6, %17 : vector<4x256xi1>, vector<4x256xf32>
    %cst_7 = arith.constant dense<0.000000e+00> : vector<256xf32>
    %19 = vector.multi_reduction <add>, %18, %cst_7 [0] : vector<4x256xf32> to vector<256xf32>
    %20 = vector.shape_cast %19 : vector<256xf32> to vector<1x256xf32>
    %21 = arith.subf %16, %9 : vector<1x256xf32>
    %22 = tpu.reciprocal %8 {approx = true} : vector<1x256xf32> -> vector<1x256xf32>
    %23 = arith.mulf %20, %22 : vector<1x256xf32>
    %cst_8 = arith.constant 1.000000e+00 : f32
    %24 = vector.broadcast %cst_8 : f32 to vector<1x256xf32>
    %25 = arith.subf %24, %23 : vector<1x256xf32>
    %cst_9 = arith.constant 1.000000e+00 : f32
    %26 = vector.broadcast %cst_9 : f32 to vector<1x256xf32>
    %27 = arith.mulf %26, %25 : vector<1x256xf32>
    %28 = arith.mulf %27, %25 : vector<1x256xf32>
    %cst_10 = arith.constant 0.000000e+00 : f32
    %29 = vector.broadcast %cst_10 : f32 to vector<1x256xf32>
    %30 = arith.subf %29, %28 : vector<1x256xf32>
    %31 = arith.mulf %30, %21 : vector<1x256xf32>
    %c256_i32 = arith.constant 256 : i32
    %32 = arith.muli %arg0, %c256_i32 : i32
    %33 = tpu.iota {dimensions = array<i32: 1>} : vector<1x256xi32>
    %34 = vector.broadcast %32 : i32 to vector<1x256xi32>
    %35 = arith.addi %34, %33 : vector<1x256xi32>
    %c0_i32 = arith.constant 0 : i32
    %36 = vector.broadcast %c0_i32 : i32 to vector<1x256xi32>
    %37 = arith.cmpi sge, %1, %36 : vector<1x256xi32>
    %c576_i32 = arith.constant 576 : i32
    %38 = vector.broadcast %c576_i32 : i32 to vector<1x256xi32>
    %39 = arith.cmpi slt, %35, %38 : vector<1x256xi32>
    %40 = arith.andi %37, %39 : vector<1x256xi1>
    %cst_11 = arith.constant 0.000000e+00 : f32
    %41 = vector.broadcast %cst_11 : f32 to vector<1x256xf32>
    %42 = arith.select %40, %31, %41 : vector<1x256xi1>, vector<1x256xf32>
    %43 = vector.shape_cast %42 : vector<1x256xf32> to vector<1x1x256xf32>
    %cst_12 = arith.constant dense<0.000000e+00> : vector<1xf32>
    %44 = vector.multi_reduction <add>, %43, %cst_12 [1, 2] : vector<1x1x256xf32> to vector<1xf32>
    %45 = vector.shape_cast %44 : vector<1xf32> to vector<1x1x1xf32>
    %46 = vector.extract %45[0, 0, 0] : f32 from vector<1x1x1xf32>
    %cst_13 = arith.constant 1.000000e+00 : f32
    %cst_14 = arith.constant 0.000000e+00 : f32
    %47 = vector.broadcast %cst_13 : f32 to vector<1x256xf32>
    %48 = vector.broadcast %cst_14 : f32 to vector<1x256xf32>
    %49 = arith.select %40, %47, %48 : vector<1x256xi1>, vector<1x256xf32>
    %50 = vector.shape_cast %49 : vector<1x256xf32> to vector<1x1x256xf32>
    %cst_15 = arith.constant dense<0.000000e+00> : vector<1xf32>
    %51 = vector.multi_reduction <add>, %50, %cst_15 [1, 2] : vector<1x1x256xf32> to vector<1xf32>
    %52 = vector.shape_cast %51 : vector<1xf32> to vector<1x1x1xf32>
    %53 = vector.extract %52[0, 0, 0] : f32 from vector<1x1x1xf32>
    %54 = tpu.iota {dimensions = array<i32: 1>} : vector<1x2x128xi32>
    %c0_i32_16 = arith.constant 0 : i32
    %55 = vector.broadcast %c0_i32_16 : i32 to vector<1x2x128xi32>
    %56 = arith.cmpi eq, %54, %55 : vector<1x2x128xi32>
    %57 = vector.broadcast %46 : f32 to vector<1x2x128xf32>
    %58 = vector.broadcast %53 : f32 to vector<1x2x128xf32>
    %59 = arith.select %56, %57, %58 : vector<1x2x128xi1>, vector<1x2x128xf32>
    %c0_17 = arith.constant 0 : index
    %c0_18 = arith.constant 0 : index
    %c0_19 = arith.constant 0 : index
    %60 = vector.load %arg3[%c0_17, %c0_18, %c0_19] : memref<1x2x128xf32, #tpu.memory_space<vmem>>, vector<1x2x128xf32>
    tpu.vector_store %arg3[%c0_17, %c0_18, %c0_19], %59 {strides = array<i32>} : memref<1x2x128xf32, #tpu.memory_space<vmem>>, vector<1x2x128xf32>,
    return
  }
  func.func @transform_0(%arg0: i32) -> (i32, i32) {
    %c0_i32 = arith.constant 0 : i32
    %c0_i32_0 = arith.constant 0 : i32
    return %c0_i32, %arg0 : i32, i32
  }
  func.func @transform_1(%arg0: i32) -> (i32, i32) {
    %c0_i32 = arith.constant 0 : i32
    %c0_i32_0 = arith.constant 0 : i32
    return %c0_i32, %arg0 : i32, i32
  }
  func.func @transform_2(%arg0: i32) -> (i32, i32, i32) {
    %c0_i32 = arith.constant 0 : i32
    %c0_i32_0 = arith.constant 0 : i32
    %c0_i32_1 = arith.constant 0 : i32
    return %arg0, %c0_i32, %c0_i32_0 : i32, i32, i32
  }
}

</mosaic_0001>

<bundles_post_ra>
// kernel: tpu_custom_call.1
= control target key start
LH: loop header
LB: loop body
LE: loop exit
PB: predicated region body
PF: predicated region fallthrough
CT: control target
= control target key end

     0   :  { %7 = vsyncpa [#allocation3], 0  ;;  %s984_s0 = inlined_call_operand.hbm [shape: f32[4,576], index: 0, kind: input, shape index: {}]   ;;  %s985_s1 = inlined_call_operand.hbm [shape: s32[1,576], index: 1, kind: input, shape index: {}]   ;;  %s986_s2 = inlined_call_operand.hbm [shape: f32[3,2,128], index: 2, kind: output, shape index: {}]  }
   0x1   :  { %9 = vsyncpa [#allocation3 + $0x1], 0 }
   0x2   :  { %10 = vsyncpa [#allocation6], 0 }
   0x3   :  { %12 = vsyncpa [#allocation6 + $0x1], 0 }
   0x4   :  { %13 = vsyncpa [#allocation4], 0 }
   0x5   :  { %15 = vsyncpa [#allocation4 + $0x1], 0  ;;  %s764_s9 = smov 0   ;;  %s766_s10 = smov 0  }
   0x6   :  { %s768_s11 = smov 0   ;;  %s770_s12 = smov 0  }
   0x7 LB: > { %s785_s13 = sadd.s32 4294967295, %s741_s12   ;;  %s536_s14 = sadd.s32 4294967294, %s741_s12   ;;  %s741_s12 = sphi %s770_s12, %s1001_s12   ;;  %s737_s11 = sphi %s768_s11, %s1000_s11   ;;  %s733_s10 = sphi %s766_s10, %s999_s10   ;;  %s729_s9 = sphi %s764_s9, %s998_s9  }
   0x8   : > { %s789_s15 = sadd.s32 1, %s741_s12   ;;  %s28_s16 = sadd.s32 1, %s737_s11 }
   0x9   : > { %s25_s17 = ssub.s32 %s741_s12, %s789_s15  ;;  %p35_p0 = scmp.ne.s32.totalorder %s737_s11, %s733_s10 }
   0xa   : > { %p26_p1 = scmp.eq.s32.totalorder %s25_s17, 0  ;;  %p36_p2 = scmp.eq.s32.totalorder %s741_s12, 0 }
   0xb   : > { %p41_p3 = scmp.ne.s32.totalorder %s733_s10, %s729_s9  ;;  %p42_p4 = scmp.eq.s32.totalorder %s785_s13, 0 }
   0xc   : > { %s801_s18 = scalar_select %p26_p1, %s737_s11, %s28_s16  }
   0xd   : > { %p803_p5 = por %p36_p2, %p35_p0  ;;  %p807_p6 = por %p42_p4, %p41_p3 }
   0xe   : > { %p91_p7 = scmp.eq.s32.totalorder %s785_s13, 2  ;;  %p97_p8 = scmp.eq.s32.totalorder %s536_s14, 2 }
   0xf   : > { %s990_s20 = scalar_select %p807_p6, 1, 0 }
  0x10   : > { %p812_p9 = por %p91_p7, %p35_p0  ;;  %p816_p10 = por %p97_p8, %p41_p3 }
  0x11   : > { %p538_p11 = scmp.ge.s32.totalorder %s741_s12, 3 }
  0x12   : > { %s991_s21 = scalar_select %p812_p9, 1, 0 }
  0x13   : > { %s992_s22 = scalar_select %p816_p10, 1, 0 }
  0x14   : > { %113 = sbr.rel (%p538_p11) target bundleno = 87 (0x57), region = 16 }
  0x19   : > { %116 = sbr.rel (!%p803_p5) target bundleno = 56 (0x38), region = 20  ;;  %s117_s23 = sand.u32 (%p803_p5), 1, %s737_s11  }
  0x1a   : > { %s540_s24 = sshll.u32 (%p803_p5), %s741_s12, 1  ;;  %s539_s25 = sshll.u32 (%p803_p5), %s117_s23, 3 }
  0x1b   : > { %s123_s26 = ssub.s32 (%p803_p5), 5, %s540_s24  ;;  %s828_s29 = scalar_lea.sflag (%p803_p5), [#allocation3], %s117_s23 }
  0x1c   : > { %p124_p12 = scmp.lt.s32.totalorder (%p803_p5), %s123_s26, 2  ;;  %s121_s30 = scalar_lea.vmem (%p803_p5), [#allocation2], %s539_s25 }
  0x1e   : > { %s1003_s26 = smov (!%p124_p12, %s123_s26), 2 }
  0x1f   : > { %s825_s27 = sshll.u32 %s1003_s26, 6 }
  0x20   : > { %s128_s28 = ssub.s32 128, %s825_s27 }
  0x21   : > { %129 = vsyncadd %s828_s29, %s128_s28  ;;  %p542_p13 = scmp.ne.s32.totalorder %s825_s27, 0  ;;  %s560_s3 = sshll.u32 %s741_s12, 7 }
  0x22   : > { %s132_s6 = scalar_lea.hbm %s984_s0, %s560_s3  ;;  %s135_s7 = sshll.u32 %s121_s30, 4  ;;  %s136_s7 = int_to_ptr.vmem [resolvable:$true] %s135_s7 }
  0x23   : > { %s621_s8 = scalar_lea.hbm %s132_s6, %s825_s27  ;;  %s625_s17 = scalar_lea.hbm %s984_s0, 320 }
  0x24   : > { %p622_p0 = scmp.ne.s32.totalorder %s132_s6, %s621_s8  ;;  %p626_p3 = scmp.lt.s32.totalorder %s132_s6, %s984_s0 }
  0x25   : > { %p627_p4 = scmp.lt.s32.totalorder %s625_s17, %s621_s8 }
  0x26   : > { %p623_p1 = pnand %p622_p0, %p542_p13 }
  0x27   : > { %p628_p7 = por %p627_p4, %p626_p3 }
  0x28   : > { %p624_p2 = pneg %p623_p1 }
  0x2a   : > { %p629_p8 = pnand %p628_p7, %p624_p2 }
  0x2c   : > { %632 = shalt.err (!%p629_p8)
}
  0x2d   : > { %s633_s25 = scalar_lea.vmem %s136_s7, %s825_s27  ;;  %s743_s26 = smov [#allocation2]  }
  0x2e   : > { %p634_p11 = scmp.ne.s32.totalorder %s136_s7, %s633_s25  ;;  %s637_s28 = sshll.u32 %s743_s26, 4  ;;  %s638_s28 = int_to_ptr.vmem [resolvable:$false] %s637_s28 }
  0x2f   : > { %s639_s30 = scalar_lea.vmem %s638_s28, 256  ;;  %p640_p1 = scmp.lt.s32.totalorder %s136_s7, %s638_s28 }
  0x30   : > { %p635_p12 = pnand %p634_p11, %p542_p13  ;;  %p641_p10 = scmp.lt.s32.totalorder %s639_s30, %s633_s25 }
  0x32   : > { %p636_p0 = pneg %p635_p12  ;;  %p642_p9 = por %p641_p10, %p640_p1 }
  0x34   : > { %p643_p6 = pnand %p642_p9, %p636_p0 }
  0x36   : > { %646 = shalt.err (!%p643_p6)
}
  0x37   : > { %138 = dma.hbm_to_vmem [thread:$0]  (%p542_p13), %s132_s6, %s825_s27, %s136_s7, %s828_s29  }
  0x38 PF: > { %141 = sbr.rel (!%p803_p5) target bundleno = 87 (0x57), region = 24  ;;  %s142_s3 = sand.u32 (%p803_p5), 1, %s737_s11  }
  0x39   : > { %s547_s4 = sshll.u32 (%p803_p5), %s741_s12, 1  ;;  %s546_s5 = sshll.u32 (%p803_p5), %s142_s3, 1 }
  0x3a   : > { %s148_s8 = ssub.s32 (%p803_p5), 5, %s547_s4  ;;  %s859_s17 = scalar_lea.sflag (%p803_p5), [#allocation6], %s142_s3 }
  0x3b   : > { %p149_p2 = scmp.lt.s32.totalorder (%p803_p5), %s148_s8, 2  ;;  %s146_s27 = scalar_lea.vmem (%p803_p5), [#allocation5], %s546_s5 }
  0x3d   : > { %s1005_s8 = smov (!%p149_p2, %s148_s8), 2 }
  0x3e   : > { %s856_s14 = sshll.u32 %s1005_s8, 4 }
  0x3f   : > { %s153_s16 = ssub.s32 32, %s856_s14 }
  0x40   : > { %154 = vsyncadd %s859_s17, %s153_s16  ;;  %p549_p5 = scmp.ne.s32.totalorder %s856_s14, 0  ;;  %s561_s19 = sshll.u32 %s741_s12, 5 }
  0x41   : > { %s157_s7 = scalar_lea.hbm %s985_s1, %s561_s19  ;;  %s159_s23 = sshll.u32 %s146_s27, 4  ;;  %s160_s23 = int_to_ptr.vmem [resolvable:$true] %s159_s23 }
  0x42   : > { %s647_s24 = scalar_lea.hbm %s157_s7, %s856_s14  ;;  %s651_s28 = scalar_lea.hbm %s985_s1, 80 }
  0x43   : > { %p648_p6 = scmp.ne.s32.totalorder %s157_s7, %s647_s24  ;;  %p652_p13 = scmp.lt.s32.totalorder %s157_s7, %s985_s1 }
  0x44   : > { %p653_p3 = scmp.lt.s32.totalorder %s651_s28, %s647_s24 }
  0x45   : > { %p649_p9 = pnand %p648_p6, %p549_p5 }
  0x46   : > { %p654_p4 = por %p653_p3, %p652_p13 }
  0x47   : > { %p650_p10 = pneg %p649_p9 }
  0x49   : > { %p655_p7 = pnand %p654_p4, %p650_p10 }
  0x4b   : > { %658 = shalt.err (!%p655_p7)
}
  0x4c   : > { %s659_s4 = scalar_lea.vmem %s160_s23, %s856_s14  ;;  %s744_s5 = smov [#allocation5]  }
  0x4d   : > { %p660_p8 = scmp.ne.s32.totalorder %s160_s23, %s659_s4  ;;  %s663_s8 = sshll.u32 %s744_s5, 4  ;;  %s664_s8 = int_to_ptr.vmem [resolvable:$false] %s663_s8 }
  0x4e   : > { %s665_s16 = scalar_lea.vmem %s664_s8, 64  ;;  %p666_p0 = scmp.lt.s32.totalorder %s160_s23, %s664_s8 }
  0x4f   : > { %p661_p11 = pnand %p660_p8, %p549_p5  ;;  %p667_p1 = scmp.lt.s32.totalorder %s665_s16, %s659_s4 }
  0x51   : > { %p662_p12 = pneg %p661_p11  ;;  %p668_p2 = por %p667_p1, %p666_p0 }
  0x53   : > { %p669_p6 = pnand %p668_p2, %p662_p12 }
  0x55   : > { %672 = shalt.err (!%p669_p6)
}
  0x56   : > { %162 = dma.hbm_to_vmem [thread:$0]  (%p549_p5), %s157_s7, %s856_s14, %s160_s23, %s859_s17  }
  0x57 PF: > { %p551_p9 = scmp.ge.s32.totalorder %s741_s12, 1  ;;  %p164_p10 = scmp.lt.s32.totalorder %s741_s12, 4 }
  0x59   : > { %p165_p13 = pnand %p551_p9, %p164_p10 }
  0x5a   : > { %s886_s27 = sand.u32 (!%p165_p13), 1, %s733_s10   ;;  %p993_p3 = scmp.ne.s32.totalorder (!%p165_p13), %s990_s20, 0 }
  0x5b   : > { %168 = sbr.rel (%p165_p13) target bundleno = 407 (0x197), region = 28  ;;  %s552_s19 = sshll.u32 (!%p165_p13), %s886_s27, 3 }
  0x5c   : > { %s171_s29 = scalar_lea.sflag (!%p165_p13), [#allocation3], %s886_s27  ;;  %s174_s6 = scalar_lea.vmem (!%p165_p13), [#allocation2], %s552_s19 }
  0x60   : > { %716 = dma.done.wait (%p993_p3), %s171_s29, 128  }
  0x61   : > { %718 = vsyncadd (%p993_p3), %s171_s29, 4294967168  ;;  %s553_s14 = sshll.u32 %s886_s27, 1  ;;  %s180_s17 = scalar_lea.sflag [#allocation6], %s886_s27 }
  0x62   : > { %s183_s7 = scalar_lea.vmem [#allocation5], %s553_s14 }
  0x63   : > { %720 = dma.done.wait (%p993_p3), %s180_s17, 32  }
  0x64   : > { %722 = vsyncadd (%p993_p3), %s180_s17, 4294967264  ;;  %vm224_vm0 = vcmask 1043456   ;;  %v219_v0 = vld [vmem:[%s174_s6] sm:$0xff]  ;;  %v267_v17 = vlaneseq  ;;  %v909_v22 = vld [vmem:[%s183_s7] sm:$0x3]  ;;  %s555_s20 = sshll.u32 %s785_s13, 8 }
  0x65   : > { %v222_v1 = vcombine.high %v219_v0, %v219_v0  ;;  %v225_v2 = vsel %vm224_vm0, %v219_v0, -inf  ;;  %v332_v61 = vstv %s555_s20  ;;  %vm335_vm5 = vcmp.ge.s32.totalorder %v909_v22, 0  ;;  %s557_s23 = sshll.u32 %s785_s13, 5  ;;  %s208_s25 = scalar_lea.vmem [#allocation7], %s553_s14 }
  0x66   : > { %v226_v3 = vrot.slane %v225_v2, 4  ;;  %v904_v20 = vshrl.u32 %v267_v17, 7  ;;  %v330_v49 = vand.u32 127, %v267_v17  ;;  %vm387_vm8 = vcmask 1040384   ;;  %s443_s26 = sshll.u32 %s208_s25, 4  ;;  %s948_s4 = scalar_lea.hbm %s986_s2, %s557_s23  ;;  %s444_s26 = int_to_ptr.vmem [resolvable:$true] %s443_s26 }
  0x67   : > { %v232_v4 = vsel %vm224_vm0, %v222_v1, -inf  ;;  %s430_s5 = scalar_lea.sflag [#allocation4], %s886_s27  ;;  %s673_s8 = scalar_lea.vmem %s444_s26, 32 }
  0x68   : > { %v227_v5 = vmax.f32 %v225_v2, %v226_v3  ;;  %v233_v6 = vrot.slane %v232_v4, 4  ;;  %v907_v21 = vsub.s32 0, %v904_v20  ;;  %v912_v23 = vsub.s32 1, %v904_v20  ;;  %p674_p5 = scmp.ne.s32.totalorder %s444_s26, %s673_s8  ;;  %p996_p4 = scmp.ne.s32.totalorder %s991_s21, 0 }
  0x69   : > { %v331_v58 = vadd.s32 128, %v330_v49  ;;  %v333_v1 = vadd.s32 %v332_v61, %v330_v49  ;;  %vm424_vm9 = vcmp.eq.s32.totalorder %v904_v20, 0  ;;  %s748_s13 = smov [#allocation7]  }
  0x6a   : > { %v228_v7 = vrot.slane %v227_v5, 2  ;;  %v234_v8 = vmax.f32 %v232_v4, %v233_v6  ;;  %v272_v24 = vrot.slane %v909_v22, %v907_v21  ;;  %v276_v25 = vrot.slane %v909_v22, %v912_v23  ;;  %p675_p7 = pnand %p674_p5, %p996_p4  ;;  %s677_s16 = sshll.u32 %s748_s13, 4  ;;  %s678_s16 = int_to_ptr.vmem [resolvable:$false] %s677_s16 }
  0x6b   : > { %v334_v2 = vadd.s32 %v332_v61, %v331_v58  ;;  %vm336_vm3 = vcmp.lt.s32.totalorder %v333_v1, 576  ;;  %s679_s19 = scalar_lea.vmem %s678_s16, 64  ;;  %p680_p11 = scmp.lt.s32.totalorder %s444_s26, %s678_s16 }
  0x6c   : > { %v229_v9 = vmax.f32 %v227_v5, %v228_v7  ;;  %v235_v10 = vrot.slane %v234_v8, 2  ;;  %vm919_vm1 = vcmp.eq.s32.totalorder %v904_v20, %v272_v24  ;;  %vm278_vm2 = vcmp.eq.s32.totalorder %v904_v20, %v276_v25  ;;  %p676_p8 = pneg %p675_p7  ;;  %p681_p12 = scmp.lt.s32.totalorder %s679_s19, %s673_s8 }
  0x6d   : > { %v745_v5 = vmov 1966171168   ;;  %vm337_vm4 = vcmp.lt.s32.totalorder %v334_v2, 576 }
  0x6e   : > { %v230_v11 = vrot.slane %v229_v9, 1  ;;  %v236_v12 = vmax.f32 %v234_v8, %v235_v10  ;;  %v342_v6 = vunpack.c.l.s4 %v745_v5  ;;  %p682_p0 = por %p681_p12, %p680_p11 }
  0x70   : > { %v231_v13 = vmax.f32 %v229_v9, %v230_v11  ;;  %v237_v14 = vrot.slane %v236_v12, 1  ;;  %v343_v11 = vunpack.c.0.s8 %v342_v6  ;;  %p683_p1 = pnand %p682_p0, %p676_p8 }
  0x72   : > { %v238_v15 = vmax.f32 %v236_v12, %v237_v14  ;;  %v746_v14 = vmov 0   ;;  %v346_v24 = vsub.s32 %v343_v11, %v904_v20 }
  0x74   : > { %v241_v16 = vcombine.low %v231_v13, %v238_v15  ;;  %v338_v15 = vsel %vm336_vm3, 1, %v746_v14 }
  0x76   : > { %v243_v18 = vsub.f32 %v219_v0, %v241_v16  ;;  %v339_v16 = vsel %vm337_vm4, 1, %v746_v14 }
  0x78   : > { %v244_v19 = vmul.f32 1.442695, %v243_v18  ;;  %v280_v30 = vcombine.high %v243_v18, %v243_v18  ;;  %v282_v35 = vsel %vm919_vm1, %v243_v18, 0.0 }
  0x79   : > { %v284_v44 = vsel %vm224_vm0, %v282_v35, 0.0 }
  0x7a   : > { %611 = vpow2.f32 %v244_v19  ;;  %v283_v40 = vsel %vm278_vm2, %v280_v30, 0.0  ;;  %v285_v50 = vrot.slane %v284_v44, 4  ;;  %v340_v19 = vcombine.low %v338_v15, %v339_v16 }
  0x7b   : > { %v291_v48 = vsel %vm224_vm0, %v283_v40, 0.0 }
  0x7c   : > { %v292_v54 = vrot.slane %v291_v48, 4  ;;  %v286_v59 = vadd.f32 %v285_v50, %v284_v44 }
  0x7e   : > { %v293_v63 = vadd.f32 %v292_v54, %v291_v48  ;;  %v287_v3 = vrot.slane %v286_v59, 2 }
  0x80   : > { %v294_v7 = vrot.slane %v293_v63, 2  ;;  %v288_v9 = vadd.f32 %v287_v3, %v286_v59 }
  0x82   : > { %v295_v12 = vadd.f32 %v294_v7, %v293_v63  ;;  %v289_v17 = vrot.slane %v288_v9, 1 }
  0x84   : > { %v296_v26 = vrot.slane %v295_v12, 1 }
  0x87   : > { %v612_v27 = vpop.eup %611 }
  0x88   : > { %v247_v28 = vcombine.high %v612_v27, %v612_v27  ;;  %v249_v29 = vsel %vm224_vm0, %v612_v27, 0.0  ;;  %v298_v31 = vsel %vm919_vm1, %v612_v27, 0.0 }
  0x89   : > { %v250_v32 = vrot.slane %v249_v29, 4  ;;  %v300_v33 = vsel %vm224_vm0, %v298_v31, 0.0  ;;  %v290_v31 = vadd.f32 %v289_v17, %v288_v9 }
  0x8a   : > { %v256_v34 = vsel %vm224_vm0, %v247_v28, 0.0  ;;  %v299_v36 = vsel %vm278_vm2, %v247_v28, 0.0  ;;  %v301_v41 = vrot.slane %v300_v33, 4 }
  0x8b   : > { %v251_v37 = vadd.f32 %v250_v32, %v249_v29  ;;  %v257_v38 = vrot.slane %v256_v34, 4  ;;  %v307_v39 = vsel %vm224_vm0, %v299_v36, 0.0  ;;  %v297_v36 = vadd.f32 %v296_v26, %v295_v12 }
  0x8c   : > { %v308_v45 = vrot.slane %v307_v39, 4  ;;  %v302_v51 = vadd.f32 %v301_v41, %v300_v33 }
  0x8d   : > { %v252_v42 = vrot.slane %v251_v37, 2  ;;  %v258_v43 = vadd.f32 %v257_v38, %v256_v34  ;;  %v347_v34 = vrot.slane %v340_v19, %v346_v24 }
  0x8e   : > { %v309_v55 = vadd.f32 %v308_v45, %v307_v39  ;;  %v303_v60 = vrot.slane %v302_v51, 2 }
  0x8f   : > { %v253_v46 = vadd.f32 %v252_v42, %v251_v37  ;;  %v259_v47 = vrot.slane %v258_v43, 2  ;;  %v354_v45 = vrot.slane %v347_v34, %v346_v24 }
  0x90   : > { %v310_v0 = vrot.slane %v309_v55, 2  ;;  %v304_v4 = vadd.f32 %v303_v60, %v302_v51  ;;  %v747_v51 = vmov 0.0  }
  0x91   : > { %v254_v52 = vrot.slane %v253_v46, 1  ;;  %v260_v53 = vadd.f32 %v259_v47, %v258_v43  ;;  %vm355_vm6 = vcmp.ne.s32.totalorder %v354_v45, 0 }
  0x92   : > { %v311_v8 = vadd.f32 %v310_v0, %v309_v55  ;;  %v305_v10 = vrot.slane %v304_v4, 1  ;;  %vm356_vm7 = vmand %vm335_vm5, %vm355_vm6 }
  0x93   : > { %v255_v56 = vadd.f32 %v254_v52, %v253_v46  ;;  %v261_v57 = vrot.slane %v260_v53, 1  ;;  %v400_v52 = vsel %vm356_vm7, 1.0, %v747_v51 }
  0x94   : > { %v312_v13 = vrot.slane %v311_v8, 1  ;;  %v306_v18 = vadd.f32 %v305_v10, %v304_v4  ;;  %v405_v54 = vrot.slane %v400_v52, %v907_v21  ;;  %v409_v55 = vrot.slane %v400_v52, %v912_v23 }
  0x95   : > { %v262_v62 = vadd.f32 %v261_v57, %v260_v53  ;;  %613 = vlog2.f32 %v255_v56 }
  0x96   : > { %615 = vrcp.f32 %v255_v56  ;;  %v313_v27 = vadd.f32 %v312_v13, %v311_v8  ;;  %v412_v22 = vsel %vm387_vm8, %v405_v54, 0.0  ;;  %v413_v61 = vsel %vm387_vm8, %v409_v55, 0.0 }
  0x97   : > { %617 = vlog2.f32 %v262_v62  ;;  %v414_v63 = vadd.f32 %v413_v61, %v412_v22 }
  0x98   : > { %619 = vrcp.f32 %v262_v62 }
  0xa2   : > { %v614_v25 = vpop.eup %613 }
  0xa3   : > { %v616_v28 = vpop.eup %615  ;;  %v264_v30 = vmul.f32 0.6931472, %v614_v25 }
  0xa4   : > { %v618_v29 = vpop.eup %617  ;;  %v318_v32 = vmul.f32 %v616_v28, %v306_v18 }
  0xa5   : > { %v620_v33 = vpop.eup %619  ;;  %v266_v35 = vmul.f32 0.6931472, %v618_v29  ;;  %v314_v39 = vsub.f32 %v290_v31, %v264_v30 }
  0xa6   : > { %v319_v37 = vmul.f32 %v620_v33, %v313_v27  ;;  %v320_v38 = vsub.f32 1.0, %v318_v32 }
  0xa7   : > { %v315_v42 = vsub.f32 %v297_v36, %v266_v35 }
  0xa8   : > { %v321_v40 = vsub.f32 1.0, %v319_v37  ;;  %v322_v41 = vmul.f32 %v320_v38, %v320_v38 }
  0xaa   : > { %v323_v43 = vmul.f32 %v321_v40, %v321_v40  ;;  %v324_v44 = vsub.f32 0.0, %v322_v41 }
  0xac   : > { %v325_v46 = vsub.f32 0.0, %v323_v43  ;;  %v326_v47 = vmul.f32 %v324_v44, %v314_v39 }
  0xae   : > { %v327_v48 = vmul.f32 %v325_v46, %v315_v42 }
  0xb0   : > { %v359_v49 = vcombine.low %v326_v47, %v327_v48 }
  0xb2   : > { %v366_v50 = vrot.slane %v359_v49, %v346_v24 }
  0xb4   : > { %v373_v53 = vrot.slane %v366_v50, %v346_v24 }
  0xb6   : > { %v375_v56 = vsel %vm356_vm7, %v373_v53, 0.0 }
  0xb7   : > { %v380_v57 = vrot.slane %v375_v56, %v907_v21  ;;  %v384_v58 = vrot.slane %v375_v56, %v912_v23 }
  0xb9   : > { %v388_v59 = vsel %vm387_vm8, %v380_v57, 0.0  ;;  %v389_v60 = vsel %vm387_vm8, %v384_v58, 0.0 }
  0xba   : > { %v390_v62 = vadd.f32 %v389_v60, %v388_v59 }
  0xbc   : > { %391 = vadd.xlane.f32.xlu0 %v390_v62 }
  0xc0   : > { %415 = vadd.xlane.f32.xlu0 %v414_v63 }
 0x145   : > { %v392_v0 = vpop.xlane.xlu0 %391 }
 0x146   : > { %v393_v1 = vrot.slane %v392_v0, 4 }
 0x148   : > { %v394_v2 = vadd.f32 %v393_v1, %v392_v0 }
 0x149   : > { %v416_v3 = vpop.xlane.xlu0 %415 }
 0x14a   : > { %v395_v4 = vrot.slane %v394_v2, 2  ;;  %v417_v5 = vrot.slane %v416_v3, 4 }
 0x14c   : > { %v418_v6 = vadd.f32 %v417_v5, %v416_v3  ;;  %v396_v21 = vadd.f32 %v395_v4, %v394_v2 }
 0x14e   : > { %v419_v7 = vrot.slane %v418_v6, 2  ;;  %v397_v23 = vrot.slane %v396_v21, 1 }
 0x150   : > { %v420_v8 = vadd.f32 %v419_v7, %v418_v6  ;;  %v398_v9 = vadd.f32 %v397_v23, %v396_v21 }
 0x152   : > { %562 = vpush %v398_v9  ;;  %v421_v10 = vrot.slane %v420_v8, 1 }
 0x154   : > { %v422_v11 = vadd.f32 %v421_v10, %v420_v8 }
 0x156   : > { %564 = vpush %v422_v11 }
 0x183   : > { %s563_s24 = spop %562 }
 0x184   : > { %v425_v12 = vstv %s563_s24 }
 0x187   : > { %s565_s28 = spop %564 }
 0x188   : > { %v426_v13 = vstv %s565_s28 }
 0x189   : > { %v427_v14 = vsel %vm424_vm9, %v425_v12, %v426_v13 }
 0x18a   : > { %428 = vst [vmem:[%s208_s25] sm:$0x3] %v427_v14 }
 0x18b   : > { %686 = shalt.err (!%p683_p1)
}
 0x18c   : > { %s687_s29 = scalar_lea.hbm %s948_s4, 32  ;;  %s691_s14 = scalar_lea.hbm %s986_s2, 96 }
 0x18d   : > { %p688_p2 = scmp.ne.s32.totalorder %s948_s4, %s687_s29  ;;  %p692_p10 = scmp.lt.s32.totalorder %s948_s4, %s986_s2 }
 0x18e   : > { %p693_p13 = scmp.lt.s32.totalorder %s691_s14, %s687_s29 }
 0x18f   : > { %p689_p6 = pnand %p688_p2, %p996_p4 }
 0x190   : > { %p694_p3 = por %p693_p13, %p692_p10 }
 0x191   : > { %p690_p9 = pneg %p689_p6 }
 0x193   : > { %p695_p5 = pnand %p694_p3, %p690_p9 }
 0x195   : > { %698 = shalt.err (!%p695_p5)
}
 0x196   : > { %568 = dma.vmem_to_hbm [thread:$0]  (%p996_p4), %s444_s26, 32, %s948_s4, %s430_s5  }
 0x197 PF: > { %p574_p7 = scmp.ge.s32.totalorder %s741_s12, 2  ;;  %s455_s20 = sand.u32 1, %s729_s9  }
 0x198   : > { %p997_p8 = scmp.ne.s32.totalorder %s992_s22, 0  ;;  %s456_s23 = scalar_lea.sflag [#allocation4], %s455_s20 }
 0x19a   : > { %p571_p11 = pnand %p574_p7, %p997_p8 }
 0x19c   : > { %p572_p12 = pneg %p571_p11 }
 0x19e   : > { %724 = dma.done.wait (%p572_p12), %s456_s23, 32  }
 0x19f   : > { %726 = vsyncadd (%p572_p12), %s456_s23, 4294967264  ;;  %p18_p0 = scmp.ge.s32.totalorder %s789_s15, 5   ;;  %s998_s9 = smov %s733_s10 }
 0x1a0   : > { %s999_s10 = smov %s737_s11  ;;  %s1000_s11 = smov %s801_s18 }
 0x1a1   : > { %s1001_s12 = smov %s789_s15  ;;  %20 = sbr.rel (!%p18_p0) target bundleno = 7 (0x7), region = 86 }
 0x1a6   :  { %461 = vsyncpa [#allocation3], 1 }
 0x1a7   :  { %463 = vsyncpa [#allocation3 + $0x1], 1 }
 0x1a8   :  { %464 = vsyncpa [#allocation6], 1 }
 0x1a9   :  { %466 = vsyncpa [#allocation6 + $0x1], 1 }
 0x1aa   :  { %467 = vsyncpa [#allocation4], 1 }
 0x1ab   :  { %469 = vsyncpa [#allocation4 + $0x1], 1 }

</bundles_post_ra>
